<compile_context>
chip_gen: v7x
topology: tpu7x:2x2x1
jax: 0.10.0
libtpu: 0.0.40
codegen_flags: <defaults>
</compile_context>

<pallas_src>
import functools

import jax
import jax.numpy as jnp
from jax.experimental import pallas as pl
from jax.experimental.pallas import tpu as pltpu


_LANE = 128
_SUBLANE = 8


def _round_up(x, m):
    return ((x + m - 1) // m) * m


def _speech_classifier_kernel(x_ref,     # (B*T, D)       flattened padded features
                              lens_ref,  # (B, 1)  int32  sequence lengths
                              enc_ref,   # (Dr+1, Hp)     rows [:D]=W_enc, row [Dr]=b_enc
                              cls_ref,   # (Hp+1, Cp)     rows [:H]=W_cls, row [Hp]=b_cls
                              out_ref,   # (B, Cp) f32    lane-padded logits
                              *, T, D, Dr, Hp):
    B = out_ref.shape[0]
    BT = x_ref.shape[0]

    # ---- Encoder over all B*T rows in one MXU matmul ------------------------
    w_enc = enc_ref[:D, :]                        # (D, Hp)  static, sublane-aligned slice
    b_enc = enc_ref[Dr:Dr + 1, :]                 # (1, Hp)
    h = jnp.tanh(
        jnp.dot(x_ref[...], w_enc, preferred_element_type=jnp.float32) + b_enc
    )                                             # (BT, Hp)
    # NOTE: zero-padded time steps also go through tanh (mask zeroes them
    # below) -- wasted EUP work only, not a correctness issue.

    # ---- Length-masked mean pool as an MXU contraction ----------------------
    # mask[b, j] = 1/len[b] if column j is time step (j - b*T) of utterance b
    #              and that step is < len[b]; else 0.
    # pad_list guarantees ilens <= T, so `t_in_seq < lens` alone is sufficient.
    row = jax.lax.broadcasted_iota(jnp.int32, (B, BT), 0)
    col = jax.lax.broadcasted_iota(jnp.int32, (B, BT), 1)
    t_in_seq = col - row * T                      # int32 time index within utt b
    lens = lens_ref[...]                          # (B, 1) int32
    valid = (t_in_seq >= 0) & (t_in_seq < lens)   # int32 compares, no f32 cast
    inv_len = 1.0 / jnp.maximum(lens.astype(jnp.float32), 1.0)   # guard len==0
    mask = jnp.where(valid, inv_len, 0.0)         # (B, BT) f32

    emb = jnp.dot(mask, h, preferred_element_type=jnp.float32)   # (B, Hp)

    # ---- Classifier head (batched, single matmul) ---------------------------
    w_cls = cls_ref[:Hp, :]                       # (Hp, Cp)
    b_cls = cls_ref[Hp:, :]                       # (1, Cp)
    out_ref[...] = (
        jnp.dot(emb, w_cls, preferred_element_type=jnp.float32) + b_cls
    ).astype(out_ref.dtype)


def prepare_params(w_enc, b_enc, w_cls, b_cls):
    """One-time parameter packing.  Keep this OUT of the per-call hot path.

    Returns two lane-padded slabs, each with its bias stacked as the last row:
      enc_p: (Dr+1, Hp)   rows [:D] = W_enc, row [Dr] = b_enc
      cls_p: (Hp+1, Cp)   rows [:H] = W_cls, row [Hp] = b_cls
    """
    f32 = jnp.float32
    D, H = w_enc.shape
    C = w_cls.shape[1]
    Dr = _round_up(D, _SUBLANE)
    Hp = _round_up(H, _LANE)
    Cp = _round_up(C, _LANE)

    enc_p = jnp.zeros((Dr + 1, Hp), f32)
    enc_p = enc_p.at[:D, :H].set(w_enc.astype(f32))
    enc_p = enc_p.at[Dr, :H].set(b_enc.reshape(H).astype(f32))

    cls_p = jnp.zeros((Hp + 1, Cp), f32)
    cls_p = cls_p.at[:H, :C].set(w_cls.astype(f32))
    cls_p = cls_p.at[Hp, :C].set(b_cls.reshape(C).astype(f32))

    meta = dict(D=D, H=H, C=C, Dr=Dr, Hp=Hp, Cp=Cp)
    return enc_p, cls_p, meta


def speech_classifier_forward(xs_pad, ilens, enc_p, cls_p, meta):
    """xs_pad: [B, T, D] f32, ilens: [B] int -> logits [B, C] f32."""
    B, T, D = xs_pad.shape
    Cp = meta["Cp"]

    # Hot path: only reshapes/casts on the activations -- no padded slabs.
    x_flat = xs_pad.reshape(B * T, D).astype(jnp.float32)
    lens = ilens.reshape(B, 1).astype(jnp.int32)

    kernel = functools.partial(
        _speech_classifier_kernel,
        T=T, D=D, Dr=meta["Dr"], Hp=meta["Hp"])

    # Whole problem fits easily in VMEM -> single gridless invocation.
    # Unpadded activation arrays: full-array VMEM specs, Mosaic pads the vregs.
    vmem = pl.BlockSpec(memory_space=pltpu.MemorySpace.VMEM)
    logits_p = pl.pallas_call(
        kernel,
        out_shape=jax.ShapeDtypeStruct((B, Cp), jnp.float32),
        in_specs=[vmem, vmem, vmem, vmem],
        out_specs=vmem,
    )(x_flat, lens, enc_p, cls_p)

    return logits_p[:, :meta["C"]]


def pad_list(xs, pad_value=0.0):
    """Plain-JAX glue mirroring espnet pad_list."""
    T_max = max(x.shape[0] for x in xs)
    D = xs[0].shape[1]
    padded = []
    for x in xs:
        pad = jnp.full((T_max - x.shape[0], D), pad_value, dtype=jnp.float32)
        padded.append(jnp.concatenate([x.astype(jnp.float32), pad], axis=0))
    return jnp.stack(padded, axis=0)


def reference_forward(xs_pad, ilens, w_enc, b_enc, w_cls, b_cls):
    h = jnp.tanh(jnp.einsum("btd,dh->bth", xs_pad, w_enc) + b_enc)   # (B,T,H)
    t_idx = jnp.arange(xs_pad.shape[1])[None, :, None]
    mask = (t_idx < ilens[:, None, None]).astype(jnp.float32)
    emb = jnp.sum(h * mask, axis=1) / ilens[:, None].astype(jnp.float32)
    return emb @ w_cls + b_cls


if __name__ == "__main__":
    # Small deterministic shapes: B=2 utterances, feature dim D=16,
    # max length T=8, hidden H=32, C=4 classes.
    key = jax.random.PRNGKey(0)
    k1, k2, k3, k4, k5, k6 = jax.random.split(key, 6)

    D, H, C = 16, 32, 4
    lengths = [8, 5]

    # Variable-length utterances (mirrors the list-of-tensors input of forward).
    xs = [
        jax.random.normal(k1, (lengths[0], D), dtype=jnp.float32),
        jax.random.normal(k2, (lengths[1], D), dtype=jnp.float32),
    ]
    ilens = jnp.asarray(lengths, dtype=jnp.int32)
    xs_pad = pad_list(xs, 0.0)                    # [2, 8, 16]

    # Deterministic synthetic parameters (stand-in for checkpoint weights).
    w_enc = jax.random.normal(k3, (D, H), dtype=jnp.float32) * 0.1
    b_enc = jax.random.normal(k4, (1, H), dtype=jnp.float32) * 0.1
    w_cls = jax.random.normal(k5, (H, C), dtype=jnp.float32) * 0.1
    b_cls = jax.random.normal(k6, (1, C), dtype=jnp.float32) * 0.1

    # One-time parameter packing (kept out of the per-call path).
    enc_p, cls_p, meta = prepare_params(w_enc, b_enc, w_cls, b_cls)
    enc_p, cls_p = jax.block_until_ready((enc_p, cls_p))

    logits = speech_classifier_forward(xs_pad, ilens, enc_p, cls_p, meta)
    logits = jax.block_until_ready(logits)

    ref = reference_forward(xs_pad, ilens, w_enc, b_enc, w_cls, b_cls)
    assert logits.shape == (2, C), logits.shape
    assert jnp.allclose(logits, ref, atol=1e-4, rtol=1e-4), (logits, ref)

    print("KERNEL_OK")
</pallas_src>

<mosaic_0001>
module attributes {stable_mosaic.version = 11 : i64} {
  func.func @_speech_classifier_kernel(%arg0: memref<16x16xf32, #tpu.memory_space<vmem>>, %arg1: memref<2x1xi32, #tpu.memory_space<vmem>>, %arg2: memref<17x128xf32, #tpu.memory_space<vmem>>, %arg3: memref<129x128xf32, #tpu.memory_space<vmem>>, %arg4: memref<2x128xf32, #tpu.memory_space<vmem>>) attributes {dimension_semantics = [], scalar_prefetch = 0 : i64, scratch_operands = 0 : i64, tpu.core_type = #tpu.core_type<tc>} {
    %c0 = arith.constant 0 : index
    %c0_0 = arith.constant 0 : index
    %0 = vector.load %arg2[%c0, %c0_0] : memref<17x128xf32, #tpu.memory_space<vmem>>, vector<16x128xf32>
    %c16 = arith.constant 16 : index
    %c0_1 = arith.constant 0 : index
    %1 = vector.load %arg2[%c16, %c0_1] : memref<17x128xf32, #tpu.memory_space<vmem>>, vector<1x128xf32>
    %c0_2 = arith.constant 0 : index
    %c0_3 = arith.constant 0 : index
    %2 = vector.load %arg0[%c0_2, %c0_3] : memref<16x16xf32, #tpu.memory_space<vmem>>, vector<16x16xf32>
    %cst = arith.constant dense<0.000000e+00> : vector<16x128xf32>
    %3 = tpu.matmul %2, %0, %cst {dimension_numbers = #tpu.dot_dimension_numbers<[1], [0], [0], [1], [0, 0, 1, 1], [], []>} : vector<16x16xf32>, vector<16x128xf32>, vector<16x128xf32> -> vector<16x128xf32>
    %4 = vector.broadcast %1 : vector<1x128xf32> to vector<16x128xf32>
    %5 = arith.addf %3, %4 : vector<16x128xf32>
    %6 = math.tanh %5 : vector<16x128xf32>
    %7 = tpu.iota {dimensions = array<i32: 0>} : vector<2x16xi32>
    %8 = tpu.iota {dimensions = array<i32: 1>} : vector<2x16xi32>
    %c8_i32 = arith.constant 8 : i32
    %9 = vector.broadcast %c8_i32 : i32 to vector<2x16xi32>
    %10 = arith.muli %7, %9 : vector<2x16xi32>
    %11 = arith.subi %8, %10 : vector<2x16xi32>
    %c0_4 = arith.constant 0 : index
    %c0_5 = arith.constant 0 : index
    %12 = vector.load %arg1[%c0_4, %c0_5] : memref<2x1xi32, #tpu.memory_space<vmem>>, vector<2x1xi32>
    %c0_i32 = arith.constant 0 : i32
    %13 = vector.broadcast %c0_i32 : i32 to vector<2x16xi32>
    %14 = arith.cmpi sge, %11, %13 : vector<2x16xi32>
    %15 = vector.broadcast %12 : vector<2x1xi32> to vector<2x16xi32>
    %16 = arith.cmpi slt, %11, %15 : vector<2x16xi32>
    %17 = arith.andi %14, %16 : vector<2x16xi1>
    %18 = arith.sitofp %12 : vector<2x1xi32> to vector<2x1xf32>
    %cst_6 = arith.constant 1.000000e+00 : f32
    %19 = vector.broadcast %cst_6 : f32 to vector<2x1xf32>
    %20 = arith.maximumf %18, %19 : vector<2x1xf32>
    %cst_7 = arith.constant 1.000000e+00 : f32
    %21 = vector.broadcast %cst_7 : f32 to vector<2x1xf32>
    %22 = arith.divf %21, %20 : vector<2x1xf32>
    %cst_8 = arith.constant 0.000000e+00 : f32
    %23 = vector.shape_cast %22 : vector<2x1xf32> to vector<2x1xf32>
    %24 = vector.broadcast %23 : vector<2x1xf32> to vector<2x16xf32>
    %25 = vector.broadcast %cst_8 : f32 to vector<2x16xf32>
    %26 = arith.select %17, %24, %25 : vector<2x16xi1>, vector<2x16xf32>
    %cst_9 = arith.constant dense<0.000000e+00> : vector<2x128xf32>
    %27 = tpu.matmul %26, %6, %cst_9 {dimension_numbers = #tpu.dot_dimension_numbers<[1], [0], [0], [1], [0, 0, 1, 1], [], []>} : vector<2x16xf32>, vector<16x128xf32>, vector<2x128xf32> -> vector<2x128xf32>
    %c0_10 = arith.constant 0 : index
    %c0_11 = arith.constant 0 : index
    %28 = vector.load %arg3[%c0_10, %c0_11] : memref<129x128xf32, #tpu.memory_space<vmem>>, vector<128x128xf32>
    %c128 = arith.constant 128 : index
    %c0_12 = arith.constant 0 : index
    %29 = vector.load %arg3[%c128, %c0_12] : memref<129x128xf32, #tpu.memory_space<vmem>>, vector<1x128xf32>
    %cst_13 = arith.constant dense<0.000000e+00> : vector<2x128xf32>
    %30 = tpu.matmul %27, %28, %cst_13 {dimension_numbers = #tpu.dot_dimension_numbers<[1], [0], [0], [1], [0, 0, 1, 1], [], []>} : vector<2x128xf32>, vector<128x128xf32>, vector<2x128xf32> -> vector<2x128xf32>
    %31 = vector.broadcast %29 : vector<1x128xf32> to vector<2x128xf32>
    %32 = arith.addf %30, %31 : vector<2x128xf32>
    %c0_14 = arith.constant 0 : index
    %c0_15 = arith.constant 0 : index
    %33 = vector.load %arg4[%c0_14, %c0_15] : memref<2x128xf32, #tpu.memory_space<vmem>>, vector<2x128xf32>
    tpu.vector_store %arg4[%c0_14, %c0_15], %32 {strides = array<i32>} : memref<2x128xf32, #tpu.memory_space<vmem>>, vector<2x128xf32>,
    return
  }
}

</mosaic_0001>

<bundles_post_ra>
// kernel: tpu_custom_call.1
= control target key start
LH: loop header
LB: loop body
LE: loop exit
PB: predicated region body
PF: predicated region fallthrough
CT: control target
= control target key end

     0   :  { %9 = vsyncpa [#allocation3], 0  ;;  %s681_s0 = inlined_call_operand.hbm [shape: f32[16,16], index: 0, kind: input, shape index: {}]   ;;  %s682_s1 = inlined_call_operand.vmem [shape: s32[2,1], index: 1, kind: input, shape index: {}]   ;;  %s683_s2 = inlined_call_operand.hbm [shape: f32[17,128], index: 2, kind: input, shape index: {}]   ;;  %s684_s3 = inlined_call_operand.hbm [shape: f32[129,128], index: 3, kind: input, shape index: {}]   ;;  %s685_s4 = inlined_call_operand.hbm [shape: f32[2,128], index: 4, kind: output, shape index: {}]  }
   0x1   :  { %10 = vsyncpa [#allocation6], 0 }
   0x2   :  { %11 = vsyncpa [#allocation4], 0  ;;  %s576_s15 = smov [#allocation5]   ;;  %s577_s17 = smov [#allocation2]  }
   0x3   :  { %s31_s16 = sshll.u32 %s576_s15, 4  ;;  %s17_s18 = sshll.u32 %s577_s17, 4  ;;  %s32_s16 = int_to_ptr.vmem [resolvable:$true] %s31_s16  ;;  %s611_s18 = int_to_ptr.vmem [resolvable:$true] %s17_s18 }
   0x4   :  { %s482_s21 = scalar_lea.hbm %s683_s2, 384 }
   0x5   :  { %p483_p0 = scmp.ne.s32.totalorder %s683_s2, %s482_s21  ;;  %p486_p1 = scmp.lt.u32.totalorder %s482_s21, %s683_s2 }
   0x7   :  { %p488_p2 = pnand %p486_p1, %p483_p0 }
   0x9   :  { %491 = shalt.err (!%p488_p2)
}
   0xa   :  { %s492_s26 = scalar_lea.vmem %s32_s16, 384  ;;  %p497_p4 = scmp.lt.s32.totalorder %s32_s16, %s32_s16 }
   0xb   :  { %p493_p3 = scmp.ne.s32.totalorder %s32_s16, %s492_s26  ;;  %p498_p5 = scmp.lt.s32.totalorder %s492_s26, %s492_s26 }
   0xd   :  { %p499_p6 = por %p498_p5, %p497_p4 }
   0xf   :  { %p500_p7 = pnand %p499_p6, %p493_p3 }
  0x11   :  { %503 = shalt.err (!%p500_p7)
}
  0x12   :  { %s578_s27 = smov 128   ;;  %s579_s28 = smov 8  }
  0x13   :  { %37 = dma.hbm_to_vmem [thread:$0]  %s683_s2, 384, %s32_s16, [#allocation6], %s578_s27, %s578_s27, %s579_s28  }
  0x14   :  { %s504_s7 = scalar_lea.hbm %s681_s0, 256 }
  0x15   :  { %p505_p8 = scmp.ne.s32.totalorder %s681_s0, %s504_s7  ;;  %p508_p9 = scmp.lt.u32.totalorder %s504_s7, %s681_s0 }
  0x17   :  { %p510_p10 = pnand %p508_p9, %p505_p8 }
  0x19   :  { %513 = shalt.err (!%p510_p10)
}
  0x1a   :  { %s514_s12 = scalar_lea.vmem %s611_s18, 256  ;;  %p519_p12 = scmp.lt.s32.totalorder %s611_s18, %s611_s18 }
  0x1b   :  { %p515_p11 = scmp.ne.s32.totalorder %s611_s18, %s514_s12  ;;  %p520_p13 = scmp.lt.s32.totalorder %s514_s12, %s514_s12 }
  0x1d   :  { %p521_p0 = por %p520_p13, %p519_p12 }
  0x1f   :  { %p522_p1 = pnand %p521_p0, %p515_p11 }
  0x21   :  { %525 = shalt.err (!%p522_p1)
}
  0x22   :  { %23 = dma.hbm_to_vmem [thread:$0]  %s681_s0, 256, %s611_s18, [#allocation3], %s578_s27, %s578_s27, %s579_s28  }
  0x23   :  { %s580_s14 = smov [#allocation7]   ;;  %s526_s19 = scalar_lea.hbm %s684_s3, 2176 }
  0x24   :  { %s43_s15 = sshll.u32 %s580_s14, 4  ;;  %p527_p2 = scmp.ne.s32.totalorder %s684_s3, %s526_s19  ;;  %s44_s15 = int_to_ptr.vmem [resolvable:$true] %s43_s15 }
  0x25   :  { %p530_p3 = scmp.lt.u32.totalorder %s526_s19, %s684_s3 }
  0x27   :  { %p532_p4 = pnand %p530_p3, %p527_p2 }
  0x29   :  { %535 = shalt.err (!%p532_p4)
}
  0x2a   :  { %s536_s24 = scalar_lea.vmem %s44_s15, 2176  ;;  %p541_p6 = scmp.lt.s32.totalorder %s44_s15, %s44_s15 }
  0x2b   :  { %p537_p5 = scmp.ne.s32.totalorder %s44_s15, %s536_s24  ;;  %p542_p7 = scmp.lt.s32.totalorder %s536_s24, %s536_s24 }
  0x2d   :  { %p543_p8 = por %p542_p7, %p541_p6 }
  0x2f   :  { %p544_p9 = pnand %p543_p8, %p537_p5 }
  0x31   :  { %547 = shalt.err (!%p544_p9)
}
  0x32   :  { %49 = dma.hbm_to_vmem [thread:$0]  %s684_s3, 2176, %s44_s15, [#allocation6], %s578_s27, %s578_s27, %s579_s28  }
  0x33   :  { %570 = dma.done.wait [#allocation3], 256  }
  0x34   :  { %571 = vsyncadd [#allocation3], 4294967040 }
  0x35   :  { %572 = dma.done.wait [#allocation6], 2560  }
  0x36   :  { %573 = vsyncadd [#allocation6], 4294964736  ;;  %v581_v0 = vmov 0   ;;  %vm68_vm0 = vcmask 130048   ;;  %v59_v1 = vld [vmem:[#allocation5] sm:$0xff]  ;;  %v60_v2 = vld [vmem:[#allocation5 + $0x8] sm:$0xff]  ;;  %v152_v36 = vlaneseq }
  0x37   :  { %475 = vset.pattern.permute.xlu0 %v581_v0  ;;  %v62_v3 = vld [vmem:[#allocation2] sm:$0xff]  ;;  %v434_v4 = vpack.c.bf16 %v60_v2, %v59_v1  ;;  %v63_v7 = vld [vmem:[#allocation2 + $0x8] sm:$0xff]  ;;  %v582_v10 = vmov 0.0|0.0   ;;  %vm583_vm1 = vmmov 0   ;;  %v584_v11 = vmov 0.0   ;;  %v249_v13 = vld [vmem:[#allocation7 + $0x8] sm:$0xff] }
  0x38   :  { %389 = vmatprep.mubr.msk.f32.mxu1 %vm68_vm0, %v62_v3  ;;  %v158_v5 = vld [vmem:[%s682_s1] sm:$0x3]  ;;  %441 = vmatprep.subr.bf16.mxu0 %v582_v10  ;;  %v248_v12 = vld [vmem:[#allocation7] sm:$0xff]  ;;  %v250_v14 = vld [vmem:[#allocation7 + $0x10] sm:$0xff]  ;;  %v153_v41 = vshrl.u32 %v152_v36, 7  ;;  %v155_v43 = vand.u32 127, %v152_v36 }
  0x39   :  { %161 = vperm.xlu0 %475, %v158_v5   ;;  %v165_v6 = vcvt.s32.f32 %v158_v5  ;;  %435 = vmatprep.subr.bf16.mxu1 %v434_v4  ;;  %v442_v15 = vpack.c.bf16 %v249_v13, %v248_v12  ;;  %v251_v16 = vld [vmem:[#allocation7 + $0x18] sm:$0xff]  ;;  %v252_v18 = vld [vmem:[#allocation7 + $0x20] sm:$0xff]  ;;  %v253_v19 = vld [vmem:[#allocation7 + $0x28] sm:$0xff]  ;;  %s585_s1 = smov [#allocation8]  }
  0x3a   :  { %437 = vmatpush3.bf16.msra.mxu1 %v434_v4  ;;  %431 = vmatprep.mubr.msk.f32.mxu0 %vm583_vm1, %v584_v11  ;;  %v445_v17 = vpack.c.bf16 %v251_v16, %v250_v14  ;;  %v448_v20 = vpack.c.bf16 %v253_v19, %v252_v18  ;;  %v254_v21 = vld [vmem:[#allocation7 + $0x30] sm:$0xff]  ;;  %v255_v22 = vld [vmem:[#allocation7 + $0x38] sm:$0xff]  ;;  %v256_v24 = vld [vmem:[#allocation7 + $0x40] sm:$0xff]  ;;  %v156_v44 = vmul.u32 8, %v153_v41  ;;  %s346_s3 = sshll.u32 %s585_s1, 4  ;;  %s347_s3 = int_to_ptr.vmem [resolvable:$true] %s346_s3 }
  0x3b   :  { %v166_v8 = vmax.f32 %v165_v6, 1.0  ;;  %438 = vmatprep.subr.bf16.mxu1 %v582_v10  ;;  %443 = vmatpush3.bf16.msra.mxu0 %v442_v15  ;;  %v451_v23 = vpack.c.bf16 %v255_v22, %v254_v21  ;;  %v257_v25 = vld [vmem:[#allocation7 + $0x48] sm:$0xff]  ;;  %v258_v27 = vld [vmem:[#allocation7 + $0x50] sm:$0xff]  ;;  %v259_v28 = vld [vmem:[#allocation7 + $0x58] sm:$0xff]  ;;  %s548_s27 = scalar_lea.vmem %s347_s3, 32  ;;  %p553_p11 = scmp.lt.s32.totalorder %s347_s3, %s347_s3 }
  0x3c   :  { %444 = vmatprep.subr.bf16.mxu0 %v582_v10  ;;  %v454_v26 = vpack.c.bf16 %v257_v25, %v256_v24  ;;  %v457_v29 = vpack.c.bf16 %v259_v28, %v258_v27  ;;  %v260_v30 = vld [vmem:[#allocation7 + $0x60] sm:$0xff]  ;;  %v261_v31 = vld [vmem:[#allocation7 + $0x68] sm:$0xff]  ;;  %v262_v33 = vld [vmem:[#allocation7 + $0x70] sm:$0xff]  ;;  %v157_v45 = vsub.s32 %v155_v43, %v156_v44  ;;  %p549_p10 = scmp.ne.s32.totalorder %s347_s3, %s548_s27  ;;  %p554_p12 = scmp.lt.s32.totalorder %s548_s27, %s548_s27 }
  0x3d   :  { %476 = vrcp.f32 %v166_v8  ;;  %390 = vmatmul.mubr.msk.f32.vlgmr.msra.gmra.mrb[0].mxu1 %vm68_vm0, %v63_v7  ;;  %v460_v32 = vpack.c.bf16 %v261_v31, %v260_v30  ;;  %v263_v34 = vld [vmem:[#allocation7 + $0x78] sm:$0xff]  ;;  %v360_v54 = vld [vmem:[#allocation7 + $0x80] ss:$0 sm:$0xff] }
  0x3e   :  { %396 = vmatprep.mubr.msk.f32.mxu1 %vm583_vm1, %v584_v11  ;;  %v463_v35 = vpack.c.bf16 %v263_v34, %v262_v33  ;;  %v356_v37 = vld [vmem:[#allocation5 + $0x10] ss:$0 sm:$0xff]  ;;  %vm159_vm3 = vcmp.ge.s32.totalorder %v157_v45, 0  ;;  %p555_p13 = por %p554_p12, %p553_p11 }
  0x3f   :  { %446 = vmatpush3.bf16.msra.mxu0 %v445_v17 }
  0x40   :  { %447 = vmatprep.subr.bf16.mxu0 %v582_v10  ;;  %p556_p0 = pnand %p555_p13, %p549_p10 }
  0x43   :  { %449 = vmatpush3.bf16.msra.mxu0 %v448_v20 }
  0x44   :  { %450 = vmatprep.subr.bf16.mxu0 %v582_v10 }
  0x47   :  { %v477_v9 = vpop.eup %476  ;;  %452 = vmatpush3.bf16.msra.mxu0 %v451_v23 }
  0x48   :  { %171 = vperm.xlu0 %475, %v477_v9   ;;  %453 = vmatprep.subr.bf16.mxu0 %v582_v10 }
  0x4b   :  { %455 = vmatpush3.bf16.msra.mxu0 %v454_v26 }
  0x4c   :  { %456 = vmatprep.subr.bf16.mxu0 %v582_v10 }
  0x4f   :  { %458 = vmatpush3.bf16.msra.mxu0 %v457_v29 }
  0x50   :  { %459 = vmatprep.subr.bf16.mxu0 %v582_v10 }
  0x53   :  { %461 = vmatpush3.bf16.msra.mxu0 %v460_v32 }
  0x54   :  { %462 = vmatprep.subr.bf16.mxu0 %v582_v10 }
  0x57   :  { %464 = vmatpush3.bf16.msra.mxu0 %v463_v35 }
  0xb8   :  { %v162_v46 = vpop.permute.xlu0 %161 }
  0xb9   :  { %vm163_vm2 = vcmp.lt.s32.totalorder %v157_v45, %v162_v46 }
  0xba   :  { %vm164_vm4 = vmand %vm159_vm3, %vm163_vm2 }
  0xc7   :  { %v172_v50 = vpop.permute.xlu0 %171 }
  0xc8   :  { %v174_v51 = vsel %vm164_vm4, %v172_v50, 0.0 }
 0x110   :  { %v391_v38 = vpop.f32.mrb[0].mxu1 }
 0x111   :  { %v147_v39 = vadd.f32 %v391_v38, %v356_v37  ;;  %v141_v40 = vpop.f32.mrb[1].mxu1 }
 0x112   :  { %v142_v42 = vadd.f32 %v356_v37, %v141_v40 }
 0x113   :  { %478 = vtanh.f32 %v147_v39 }
 0x114   :  { %480 = vtanh.f32 %v142_v42 }
 0x11d   :  { %v479_v47 = vpop.eup %478 }
 0x11e   :  { %v481_v48 = vpop.eup %480 }
 0x11f   :  { %v439_v49 = vpack.c.bf16 %v479_v47, %v481_v48 }
 0x121   :  { %440 = vmatpush3.bf16.msra.mxu1 %v439_v49 }
 0x124   :  { %397 = vmatmul.mubr.msk.f32.vlgmr.msra.gmra.mrb[2].mxu1 %vm68_vm0, %v174_v51 }
 0x1f7   :  { %v244_v52 = vpop.f32.mrb[2].mxu1 }
 0x1f8   :  { %v398_v53 = vpop.f32.mrb[3].mxu1  ;;  %432 = vmatmul.mubr.f32.vlgmr.msra.gmra.mrb[0].mxu0 %v244_v52 }
 0x2cb   :  { %v335_v55 = vpop.f32.mrb[0].mxu0 }
 0x2cc   :  { %v336_v56 = vadd.f32 %v360_v54, %v335_v55  ;;  %v433_v57 = vpop.f32.mrb[1].mxu0 }
 0x2ce   :  { %339 = vst [vmem:[#allocation8] sm:$0x3] %v336_v56 }
 0x2cf   :  { %559 = shalt.err (!%p556_p0)
}
 0x2d0   :  { %s560_s30 = scalar_lea.hbm %s685_s4, 32 }
 0x2d1   :  { %p561_p1 = scmp.ne.s32.totalorder %s685_s4, %s560_s30  ;;  %p564_p2 = scmp.lt.u32.totalorder %s560_s30, %s685_s4 }
 0x2d3   :  { %p566_p3 = pnand %p564_p2, %p561_p1 }
 0x2d5   :  { %569 = shalt.err (!%p566_p3)
}
 0x2d6   :  { %349 = dma.vmem_to_hbm [thread:$0]  %s347_s3, 32, %s685_s4, [#allocation4]  }
 0x2d7   :  { %574 = dma.done.wait [#allocation4], 32  }
 0x2d8   :  { %575 = vsyncadd [#allocation4], 4294967264 }
 0x2d9   :  { %353 = vsyncpa [#allocation3], 1 }
 0x2da   :  { %354 = vsyncpa [#allocation6], 1 }
 0x2db   :  { %355 = vsyncpa [#allocation4], 1 }

</bundles_post_ra>
